<compile_context>
chip_gen: v5e
topology: v5e:2x2
jax: 0.10.0
libtpu: 0.0.40
codegen_flags: <defaults>
</compile_context>

<pallas_src>
import jax
import jax.numpy as jnp
from jax.experimental import pallas as pl
from jax.experimental.pallas import tpu as pltpu

HIDDEN = 128


def _round_up(x, m):
    return ((x + m - 1) // m) * m


def _mlp_kernel(x_ref, w1_ref, b1_ref, w2_ref, b2_ref, w3_ref, b3_ref, o_ref):
    x = x_ref[...].astype(jnp.bfloat16)                               # (tb, in_dim)
    h1 = jnp.dot(x, w1_ref[...], preferred_element_type=jnp.float32)  # f32 acc
    h1 = jnp.maximum(h1 + b1_ref[...], 0.0).astype(jnp.bfloat16)      # bias+ReLU f32 -> bf16
    h2 = jnp.dot(h1, w2_ref[...], preferred_element_type=jnp.float32)
    h2 = jnp.maximum(h2 + b2_ref[...], 0.0).astype(jnp.bfloat16)
    o = jnp.dot(h2, w3_ref[...], preferred_element_type=jnp.float32)  # (tb, out_dim)
    o_ref[...] = (o + b3_ref[...]).astype(o_ref.dtype)


def init_params(key, in_dim, out_dim, hidden=HIDDEN):
    """Deterministic init mimicking PyTorch nn.Linear (U(-1/sqrt(fan_in), +)).

    Weights stored [fan_in, fan_out] (transpose of PyTorch) so the kernel
    computes y = x @ W + b directly on the MXU.
    """
    ks = jax.random.split(key, 6)

    def linear(kw, kb, fan_in, fan_out):
        bound = 1.0 / jnp.sqrt(fan_in)
        w = jax.random.uniform(kw, (fan_in, fan_out), jnp.float32, -bound, bound)
        b = jax.random.uniform(kb, (1, fan_out), jnp.float32, -bound, bound)
        return w, b

    w1, b1 = linear(ks[0], ks[1], in_dim, hidden)
    w2, b2 = linear(ks[2], ks[3], hidden, hidden)
    w3, b3 = linear(ks[4], ks[5], hidden, out_dim)
    return {"w1": w1, "b1": b1, "w2": w2, "b2": b2, "w3": w3, "b3": b3}


def prepare_params(params):
    """One-time prep: cast weights to bf16 (f32 accumulation in-kernel), keep
    biases f32. No lane padding — kernel reads/writes true widths."""
    return {
        "w1": params["w1"].astype(jnp.bfloat16),
        "b1": params["b1"].astype(jnp.float32),
        "w2": params["w2"].astype(jnp.bfloat16),
        "b2": params["b2"].astype(jnp.float32),
        "w3": params["w3"].astype(jnp.bfloat16),
        "b3": params["b3"].astype(jnp.float32),
        "in_dim": params["w1"].shape[0],
        "out_dim": params["w3"].shape[1],
    }


def _choose_batch_tile(batch, tile_b_max):
    """Adaptive batch tile: enough tiles to respect tile_b_max, >=2 tiles once
    batch is non-trivial (fills both v7x TensorCores), minimal row padding."""
    n_tiles = max(1, pl.cdiv(batch, tile_b_max))
    if batch >= 32:
        n_tiles = max(n_tiles, 2)
    tile_b = _round_up(pl.cdiv(batch, n_tiles), 8)   # 8-row sublane alignment
    b_pad = _round_up(batch, tile_b)
    return tile_b, b_pad


def feed_forward_nn(obs, prep, *, tile_b_max=1024):
    """Forward pass of FeedForwardNN as a single fused, batch-tiled Pallas kernel."""
    obs = jnp.asarray(obs, jnp.float32)
    batch, in_dim = obs.shape
    hidden = prep["w2"].shape[0]
    out_dim = prep["out_dim"]
    assert in_dim == prep["in_dim"]

    tile_b, b_pad = _choose_batch_tile(batch, tile_b_max)
    obs_in = obs if b_pad == batch else jnp.pad(obs, ((0, b_pad - batch), (0, 0)))

    grid = (b_pad // tile_b,)

    flops = 2 * b_pad * (in_dim * hidden + hidden * hidden + hidden * out_dim)
    bytes_accessed = (
        b_pad * in_dim * 4                                          # obs (f32)
        + b_pad * out_dim * 4                                       # out (f32)
        + (in_dim * hidden + hidden * hidden + hidden * out_dim) * 2  # weights (bf16)
        + (2 * hidden + out_dim) * 4                                # biases (f32)
    )

    out = pl.pallas_call(
        _mlp_kernel,
        out_shape=jax.ShapeDtypeStruct((b_pad, out_dim), jnp.float32),
        grid=grid,
        in_specs=[
            pl.BlockSpec((tile_b, in_dim), lambda i: (i, 0)),     # obs: tiled over batch
            pl.BlockSpec((in_dim, hidden), lambda i: (0, 0)),     # w1: VMEM-resident
            pl.BlockSpec((1, hidden), lambda i: (0, 0)),          # b1
            pl.BlockSpec((hidden, hidden), lambda i: (0, 0)),     # w2
            pl.BlockSpec((1, hidden), lambda i: (0, 0)),          # b2
            pl.BlockSpec((hidden, out_dim), lambda i: (0, 0)),    # w3
            pl.BlockSpec((1, out_dim), lambda i: (0, 0)),         # b3
        ],
        out_specs=pl.BlockSpec((tile_b, out_dim), lambda i: (i, 0)),
        compiler_params=pltpu.CompilerParams(
            dimension_semantics=("parallel",),                    # megacore on v7x
        ),
        cost_estimate=pl.CostEstimate(
            flops=flops, transcendentals=0, bytes_accessed=bytes_accessed),
    )(obs_in, prep["w1"], prep["b1"], prep["w2"], prep["b2"],
      prep["w3"], prep["b3"])

    return out if b_pad == batch else out[:batch, :]


if __name__ == "__main__":
    key = jax.random.PRNGKey(0)
    k_obs, k_params = jax.random.split(key)

    batch, in_dim, out_dim = 8, 16, 4
    obs = jax.random.normal(k_obs, (batch, in_dim), dtype=jnp.float32)
    params = init_params(k_params, in_dim, out_dim)
    prep = prepare_params(params)

    out = feed_forward_nn(obs, prep)
    jax.block_until_ready(out)
    assert out.shape == (batch, out_dim)
    assert out.dtype == jnp.float32

    # Strict reference mirroring the kernel's mixed precision
    # (bf16 operands, f32 accumulation, bias/ReLU in f32).
    xb = obs.astype(jnp.bfloat16).astype(jnp.float32)
    w1f = prep["w1"].astype(jnp.float32)
    w2f = prep["w2"].astype(jnp.float32)
    w3f = prep["w3"].astype(jnp.float32)
    h1 = jnp.maximum(xb @ w1f + params["b1"], 0.0)
    h1 = h1.astype(jnp.bfloat16).astype(jnp.float32)
    h2 = jnp.maximum(h1 @ w2f + params["b2"], 0.0)
    h2 = h2.astype(jnp.bfloat16).astype(jnp.float32)
    ref = h2 @ w3f + params["b3"]
    assert jnp.allclose(out, ref, atol=1e-3, rtol=1e-3)

    # Loose sanity check against the original full-f32 PyTorch semantics.
    # TODO(synk): if the critic path needs exact f32 matmuls, switch weights/obs
    # to f32 (HBM cost of weights is negligible; obs is already read as f32).
    h1f = jnp.maximum(obs @ params["w1"] + params["b1"], 0.0)
    h2f = jnp.maximum(h1f @ params["w2"] + params["b2"], 0.0)
    ref_f32 = h2f @ params["w3"] + params["b3"]
    assert jnp.allclose(out, ref_f32, atol=5e-2, rtol=5e-2)

    print("KERNEL_OK")
</pallas_src>

<mosaic_0001>
module attributes {stable_mosaic.version = 11 : i64} {
  func.func @_mlp_kernel(%arg0: i32, %arg1: memref<8x16xf32, #tpu.memory_space<vmem>>, %arg2: memref<16x128xbf16, #tpu.memory_space<vmem>>, %arg3: memref<1x128xf32, #tpu.memory_space<vmem>>, %arg4: memref<128x128xbf16, #tpu.memory_space<vmem>>, %arg5: memref<1x128xf32, #tpu.memory_space<vmem>>, %arg6: memref<128x4xbf16, #tpu.memory_space<vmem>>, %arg7: memref<1x4xf32, #tpu.memory_space<vmem>>, %arg8: memref<8x4xf32, #tpu.memory_space<vmem>>) attributes {dimension_semantics = [#tpu.dimension_semantics<parallel>], iteration_bounds = array<i64: 1>, scalar_prefetch = 0 : i64, scratch_operands = 0 : i64, tpu.core_type = #tpu.core_type<tc>, window_params = [{transform_indices = @transform_0, window_bounds = array<i64: 8, 16>}, {pipeline_mode = #tpu.pipeline_mode<synchronous>, transform_indices = @transform_1, window_bounds = array<i64: 16, 128>}, {pipeline_mode = #tpu.pipeline_mode<synchronous>, transform_indices = @transform_2, window_bounds = array<i64: 1, 128>}, {pipeline_mode = #tpu.pipeline_mode<synchronous>, transform_indices = @transform_3, window_bounds = array<i64: 128, 128>}, {pipeline_mode = #tpu.pipeline_mode<synchronous>, transform_indices = @transform_4, window_bounds = array<i64: 1, 128>}, {pipeline_mode = #tpu.pipeline_mode<synchronous>, transform_indices = @transform_5, window_bounds = array<i64: 128, 4>}, {pipeline_mode = #tpu.pipeline_mode<synchronous>, transform_indices = @transform_6, window_bounds = array<i64: 1, 4>}, {transform_indices = @transform_7, window_bounds = array<i64: 8, 4>}]} {
    %c0 = arith.constant 0 : index
    %c0_0 = arith.constant 0 : index
    %0 = vector.load %arg1[%c0, %c0_0] : memref<8x16xf32, #tpu.memory_space<vmem>>, vector<8x16xf32>
    %1 = arith.truncf %0 : vector<8x16xf32> to vector<8x16xbf16>
    %c0_1 = arith.constant 0 : index
    %c0_2 = arith.constant 0 : index
    %2 = vector.load %arg2[%c0_1, %c0_2] : memref<16x128xbf16, #tpu.memory_space<vmem>>, vector<16x128xbf16>
    %cst = arith.constant dense<0.000000e+00> : vector<8x128xf32>
    %3 = tpu.matmul %1, %2, %cst {dimension_numbers = #tpu.dot_dimension_numbers<[1], [0], [0], [1], [0, 0, 1, 1], [], []>} : vector<8x16xbf16>, vector<16x128xbf16>, vector<8x128xf32> -> vector<8x128xf32>
    %c0_3 = arith.constant 0 : index
    %c0_4 = arith.constant 0 : index
    %4 = vector.load %arg3[%c0_3, %c0_4] : memref<1x128xf32, #tpu.memory_space<vmem>>, vector<1x128xf32>
    %5 = vector.broadcast %4 : vector<1x128xf32> to vector<8x128xf32>
    %6 = arith.addf %3, %5 : vector<8x128xf32>
    %cst_5 = arith.constant 0.000000e+00 : f32
    %7 = vector.broadcast %cst_5 : f32 to vector<8x128xf32>
    %8 = arith.maximumf %6, %7 : vector<8x128xf32>
    %9 = arith.truncf %8 : vector<8x128xf32> to vector<8x128xbf16>
    %c0_6 = arith.constant 0 : index
    %c0_7 = arith.constant 0 : index
    %10 = vector.load %arg4[%c0_6, %c0_7] : memref<128x128xbf16, #tpu.memory_space<vmem>>, vector<128x128xbf16>
    %cst_8 = arith.constant dense<0.000000e+00> : vector<8x128xf32>
    %11 = tpu.matmul %9, %10, %cst_8 {dimension_numbers = #tpu.dot_dimension_numbers<[1], [0], [0], [1], [0, 0, 1, 1], [], []>} : vector<8x128xbf16>, vector<128x128xbf16>, vector<8x128xf32> -> vector<8x128xf32>
    %c0_9 = arith.constant 0 : index
    %c0_10 = arith.constant 0 : index
    %12 = vector.load %arg5[%c0_9, %c0_10] : memref<1x128xf32, #tpu.memory_space<vmem>>, vector<1x128xf32>
    %13 = vector.broadcast %12 : vector<1x128xf32> to vector<8x128xf32>
    %14 = arith.addf %11, %13 : vector<8x128xf32>
    %cst_11 = arith.constant 0.000000e+00 : f32
    %15 = vector.broadcast %cst_11 : f32 to vector<8x128xf32>
    %16 = arith.maximumf %14, %15 : vector<8x128xf32>
    %17 = arith.truncf %16 : vector<8x128xf32> to vector<8x128xbf16>
    %c0_12 = arith.constant 0 : index
    %c0_13 = arith.constant 0 : index
    %18 = vector.load %arg6[%c0_12, %c0_13] : memref<128x4xbf16, #tpu.memory_space<vmem>>, vector<128x4xbf16>
    %cst_14 = arith.constant dense<0.000000e+00> : vector<8x4xf32>
    %19 = tpu.matmul %17, %18, %cst_14 {dimension_numbers = #tpu.dot_dimension_numbers<[1], [0], [0], [1], [0, 0, 1, 1], [], []>} : vector<8x128xbf16>, vector<128x4xbf16>, vector<8x4xf32> -> vector<8x4xf32>
    %c0_15 = arith.constant 0 : index
    %c0_16 = arith.constant 0 : index
    %20 = vector.load %arg7[%c0_15, %c0_16] : memref<1x4xf32, #tpu.memory_space<vmem>>, vector<1x4xf32>
    %21 = vector.broadcast %20 : vector<1x4xf32> to vector<8x4xf32>
    %22 = arith.addf %19, %21 : vector<8x4xf32>
    %c0_17 = arith.constant 0 : index
    %c0_18 = arith.constant 0 : index
    %23 = vector.load %arg8[%c0_17, %c0_18] : memref<8x4xf32, #tpu.memory_space<vmem>>, vector<8x4xf32>
    tpu.vector_store %arg8[%c0_17, %c0_18], %22 {strides = array<i32>} : memref<8x4xf32, #tpu.memory_space<vmem>>, vector<8x4xf32>,
    return
  }
  func.func @transform_0(%arg0: i32) -> (i32, i32) {
    %c0_i32 = arith.constant 0 : i32
    %c0_i32_0 = arith.constant 0 : i32
    return %arg0, %c0_i32 : i32, i32
  }
  func.func @transform_1(%arg0: i32) -> (i32, i32) {
    %c0_i32 = arith.constant 0 : i32
    %c0_i32_0 = arith.constant 0 : i32
    %c0_i32_1 = arith.constant 0 : i32
    return %c0_i32, %c0_i32_0 : i32, i32
  }
  func.func @transform_2(%arg0: i32) -> (i32, i32) {
    %c0_i32 = arith.constant 0 : i32
    %c0_i32_0 = arith.constant 0 : i32
    %c0_i32_1 = arith.constant 0 : i32
    return %c0_i32, %c0_i32_0 : i32, i32
  }
  func.func @transform_3(%arg0: i32) -> (i32, i32) {
    %c0_i32 = arith.constant 0 : i32
    %c0_i32_0 = arith.constant 0 : i32
    %c0_i32_1 = arith.constant 0 : i32
    return %c0_i32, %c0_i32_0 : i32, i32
  }
  func.func @transform_4(%arg0: i32) -> (i32, i32) {
    %c0_i32 = arith.constant 0 : i32
    %c0_i32_0 = arith.constant 0 : i32
    %c0_i32_1 = arith.constant 0 : i32
    return %c0_i32, %c0_i32_0 : i32, i32
  }
  func.func @transform_5(%arg0: i32) -> (i32, i32) {
    %c0_i32 = arith.constant 0 : i32
    %c0_i32_0 = arith.constant 0 : i32
    %c0_i32_1 = arith.constant 0 : i32
    return %c0_i32, %c0_i32_0 : i32, i32
  }
  func.func @transform_6(%arg0: i32) -> (i32, i32) {
    %c0_i32 = arith.constant 0 : i32
    %c0_i32_0 = arith.constant 0 : i32
    %c0_i32_1 = arith.constant 0 : i32
    return %c0_i32, %c0_i32_0 : i32, i32
  }
  func.func @transform_7(%arg0: i32) -> (i32, i32) {
    %c0_i32 = arith.constant 0 : i32
    %c0_i32_0 = arith.constant 0 : i32
    return %arg0, %c0_i32 : i32, i32
  }
}

</mosaic_0001>

<bundles_post_ra>
// kernel: tpu_custom_call.1
= control target key start
LH: loop header
LB: loop body
LE: loop exit
PB: predicated region body
PF: predicated region fallthrough
CT: control target
= control target key end

     0   :  { %12 = vsyncpa [#allocation3], 0  ;;  %s517_s0 = inlined_call_operand.hbm [shape: f32[8,16], index: 0, kind: input, shape index: {}]   ;;  %s518_s1 = inlined_call_operand.hbm [shape: bf16[16,128], index: 1, kind: input, shape index: {}]   ;;  %s519_s2 = inlined_call_operand.vmem [shape: f32[1,128], index: 2, kind: input, shape index: {}]   ;;  %s520_s3 = inlined_call_operand.vmem [shape: bf16[128,128], index: 3, kind: input, shape index: {}]   ;;  %s521_s4 = inlined_call_operand.vmem [shape: f32[1,128], index: 4, kind: input, shape index: {}]   ;;  %s522_s5 = inlined_call_operand.vmem [shape: bf16[128,4], index: 5, kind: input, shape index: {}]   ;;  %s523_s6 = inlined_call_operand.vmem [shape: f32[1,4], index: 6, kind: input, shape index: {}]   ;;  %s524_s7 = inlined_call_operand.vmem [shape: f32[8,4], index: 7, kind: output, shape index: {}]  }
   0x1   :  { %s19_s26 = sshll.u32 %s517_s0, 4  ;;  %s20_s26 = int_to_ptr.hbm [resolvable:$true] %s19_s26 }
   0x2   :  { %13 = vsyncpa [#allocation5], 0  ;;  %s407_s27 = smov [#allocation2]   ;;  %s29_s8 = sshll.u32 %s518_s1, 4  ;;  %s30_s8 = int_to_ptr.hbm [resolvable:$true] %s29_s8 }
   0x3   :  { %s21_s28 = sshll.u32 %s407_s27, 4  ;;  %s408_s9 = smov [#allocation4]   ;;  %s22_s28 = int_to_ptr.vmem [resolvable:$true] %s21_s28 }
   0x4   :  { %24 = dma.hbm_to_vmem [thread:$0]  %s20_s26, 128, %s22_s28, [#allocation3]  }
   0x5   :  { %s31_s10 = sshll.u32 %s408_s9, 4  ;;  %s409_s11 = smov 64   ;;  %s32_s10 = int_to_ptr.vmem [resolvable:$true] %s31_s10 }
   0x6   :  { %s410_s12 = smov 4  }
   0x7   :  { %37 = dma.hbm_to_vmem [thread:$0]  %s30_s8, 128, %s32_s10, [#allocation5], %s409_s11, %s409_s11, %s410_s12  }
   0x8   :  { %403 = dma.done.wait [#allocation3], 128  }
   0x9   :  { %404 = vsyncadd [#allocation3], 4294967168 }
   0xa   :  { %405 = dma.done.wait [#allocation5], 128  }
   0xb   :  { %406 = vsyncadd [#allocation5], 4294967168  ;;  %v331_v0 = vld [vmem:[#allocation4] sm:$0xff]  ;;  %v57_v1 = vld [vmem:[#allocation2] sm:$0xff]  ;;  %vm71_vm0 = vcmask 130048   ;;  %vm254_vm1 = vcmask 31744  }
   0xc   :  { %v339_v2 = vld [vmem:[%s520_s3 + $0x38] sm:$0xff]  ;;  %v58_v3 = vpack.c.bf16 %v57_v1, %v57_v1  ;;  %82 = vmatpush.bf16.msra.mxu0 %v331_v0  ;;  %v338_v4 = vld [vmem:[%s520_s3 + $0x30] sm:$0xff]  ;;  %v337_v5 = vld [vmem:[%s520_s3 + $0x28] sm:$0xff] }
   0xd   :  { %158 = vmatpush.bf16.msra.mxu1 %v339_v2  ;;  %v336_v6 = vld [vmem:[%s520_s3 + $0x20] sm:$0xff]  ;;  %v335_v7 = vld [vmem:[%s520_s3 + $0x18] sm:$0xff]  ;;  %v334_v8 = vld [vmem:[%s520_s3 + $0x10] sm:$0xff] }
   0xe   :  { %v333_v9 = vld [vmem:[%s520_s3 + $0x8] sm:$0xff]  ;;  %v332_v10 = vld [vmem:[%s520_s3] sm:$0xff]  ;;  %v347_v11 = vld [vmem:[%s522_s5 + $0x38] sm:$0xff] }
   0xf   :  { %266 = vmatmul.msk.bf16.vlgmr.msra.gmra.mxu0 %vm71_vm0, %v58_v3  ;;  %241 = vmatpush.bf16.msra.mxu2 %v347_v11  ;;  %v346_v12 = vld [vmem:[%s522_s5 + $0x30] sm:$0xff]  ;;  %v345_v13 = vld [vmem:[%s522_s5 + $0x28] sm:$0xff]  ;;  %v344_v14 = vld [vmem:[%s522_s5 + $0x20] sm:$0xff] }
  0x10   :  { %v343_v15 = vld [vmem:[%s522_s5 + $0x18] sm:$0xff]  ;;  %v342_v16 = vld [vmem:[%s522_s5 + $0x10] sm:$0xff]  ;;  %v352_v17 = vld [vmem:[%s519_s2] ss:$0 sm:$0xff] }
  0x11   :  { %159 = vmatpush.bf16.msra.mxu1 %v338_v4  ;;  %v341_v23 = vld [vmem:[%s522_s5 + $0x8] sm:$0xff]  ;;  %v340_v24 = vld [vmem:[%s522_s5] sm:$0xff] }
  0x12   :  { %v353_v25 = vld [vmem:[%s521_s4] ss:$0 sm:$0xff] }
  0x13   :  { %242 = vmatpush.bf16.msra.mxu2 %v346_v12  ;;  %v354_v31 = vld [vmem:[%s523_s6] ss:$0 sm:$0xff] }
  0x15   :  { %160 = vmatpush.bf16.msra.mxu1 %v337_v5 }
  0x17   :  { %243 = vmatpush.bf16.msra.mxu2 %v345_v13 }
  0x19   :  { %161 = vmatpush.bf16.msra.mxu1 %v336_v6 }
  0x1b   :  { %244 = vmatpush.bf16.msra.mxu2 %v344_v14 }
  0x1d   :  { %162 = vmatpush.bf16.msra.mxu1 %v335_v7 }
  0x1f   :  { %245 = vmatpush.bf16.msra.mxu2 %v343_v15 }
  0x21   :  { %163 = vmatpush.bf16.msra.mxu1 %v334_v8 }
  0x23   :  { %246 = vmatpush.bf16.msra.mxu2 %v342_v16 }
  0x25   :  { %164 = vmatpush.bf16.msra.mxu1 %v333_v9 }
  0x27   :  { %247 = vmatpush.bf16.msra.mxu2 %v341_v23 }
  0x29   :  { %165 = vmatpush.bf16.msra.mxu1 %v332_v10 }
  0x2b   :  { %248 = vmatpush.bf16.msra.mxu2 %v340_v24 }
  0x8c   :  { %v84_v18 = vpop.f32.mrf.mxu0 }
  0x8d   :  { %v85_v19 = vadd.f32 %v352_v17, %v84_v18 }
  0x8f   :  { %v88_v20 = vmax.f32 %v85_v19, 0.0 }
  0x91   :  { %v89_v21 = vpack.c.bf16 %v88_v20, %v88_v20 }
  0x93   :  { %166 = vmatmul.bf16.vlgmr.msra.gmra.mxu1 %v89_v21 }
  0x94   :  { %v86_v22 = vpop.f32.mrf.mxu0 }
 0x110   :  { %v167_v26 = vpop.f32.mrf.mxu1 }
 0x111   :  { %v168_v27 = vadd.f32 %v353_v25, %v167_v26 }
 0x113   :  { %v171_v28 = vmax.f32 %v168_v27, 0.0 }
 0x115   :  { %v172_v29 = vpack.c.bf16 %v171_v28, %v171_v28 }
 0x117   :  { %249 = vmatmul.bf16.vlgmr.msra.gmra.mxu2 %v172_v29 }
 0x118   :  { %v169_v30 = vpop.f32.mrf.mxu1 }
 0x19a   :  { %v250_v32 = vpop.f32.mrf.mxu2 }
 0x19b   :  { %v251_v33 = vadd.f32 %v354_v31, %v250_v32 }
 0x19d   :  { %255 = vst.msk [vmem:[%s524_s7] sm:$0xff] %vm254_vm1, %v251_v33 }
 0x1a2   :  { %v252_v34 = vpop.f32.mrf.mxu2 }
 0x1a3   :  { %260 = vsyncpa [#allocation3], 1 }
 0x1a4   :  { %261 = vsyncpa [#allocation5], 1 }

</bundles_post_ra>
